<compile_context>
chip_gen: v7x
topology: tpu7x:2x2x1
jax: 0.10.0
libtpu: 0.0.40
codegen_flags: <defaults>
</compile_context>

<pallas_src>
import jax
import jax.numpy as jnp
from jax.experimental import pallas as pl
from jax.experimental.pallas import tpu as pltpu


def _leaky_relu(x, slope=0.1):
    return jnp.where(x > 0, x, slope * x)


def _round_up(x, m):
    return ((x + m - 1) // m) * m


def autoencoder_kernel(x_ref,
                       w1_ref, b1_ref,
                       w2_ref, b2_ref,
                       w3_ref, b3_ref,
                       w4_ref, b4_ref,
                       o_ref):
    """Fused 4-layer MLP (AutoEncoder.forward) on one (tm, 128k) row tile of x.

    Weights are pre-transposed (in, out) and zero-padded to 128 multiples, so every
    matmul runs on full MXU tiles. Elementwise math and accumulation stay f32; the
    matmul operands are re-cast to the streaming dtype (f32 or bf16) between layers.
    """
    cdt = w1_ref.dtype  # matmul streaming dtype

    # encoder
    h = jnp.dot(x_ref[...], w1_ref[...],
                preferred_element_type=jnp.float32) + b1_ref[...]
    h = _leaky_relu(h)
    h = jnp.dot(h.astype(cdt), w2_ref[...],
                preferred_element_type=jnp.float32) + b2_ref[...]
    h = _leaky_relu(h)

    # decoder
    h = jnp.dot(h.astype(cdt), w3_ref[...],
                preferred_element_type=jnp.float32) + b3_ref[...]
    h = _leaky_relu(h)
    h = jnp.dot(h.astype(cdt), w4_ref[...],
                preferred_element_type=jnp.float32) + b4_ref[...]

    # sigmoid: exp on the EUP, approximate reciprocal also on the EUP
    # (frees the VALU slot carrying the bias adds / LeakyReLU selects).
    o_ref[...] = pl.reciprocal(1.0 + jnp.exp(-h), approx=True).astype(o_ref.dtype)


def autoencoder_forward(x, params, *, tm=None, compute_dtype=jnp.float32,
                        out_dtype=None):
    """x: (N, 2*hidden_dim). params: (in,out) weights + (1,out) biases (unpadded).

    Returns (N, 2*hidden_dim) in out_dtype (defaults to compute_dtype)."""
    n, d_in = x.shape
    d_out = params["w4"].shape[1]
    if out_dtype is None:
        out_dtype = compute_dtype

    # ---- zero-pad every feature dim to a multiple of 128 (lane-dense, full MXU tiles)
    d_in_p = _round_up(d_in, 128)
    d_out_p = _round_up(d_out, 128)
    padded_dims = {
        "w1": (d_in_p, 128), "w2": (128, 128),
        "w3": (128, 128),    "w4": (128, d_out_p),
    }

    def pad_w(name):
        w = params[name]
        out = jnp.zeros(padded_dims[name], compute_dtype)
        return out.at[:w.shape[0], :w.shape[1]].set(w.astype(compute_dtype))

    def pad_b(name, width):
        b = params[name]
        out = jnp.zeros((1, width), jnp.float32)  # bias adds to the f32 accumulator
        return out.at[:, :b.shape[1]].set(b.astype(jnp.float32))

    weights = [pad_w(f"w{i}") for i in range(1, 5)]
    biases = [pad_b(f"b{i}", padded_dims[f"w{i}"][1]) for i in range(1, 5)]

    # ---- row tile: large enough to amortize per-grid-step overhead, capped at 512
    # so the fused (tm, 128) f32 intermediates don't push the kernel spill-bound.
    if tm is None:
        tm = min(512, _round_up(n, 8))
    n_p = _round_up(n, tm)

    x_p = jnp.zeros((n_p, d_in_p), compute_dtype)
    x_p = x_p.at[:n, :d_in].set(x.astype(compute_dtype))

    # Row-tiled input/output; padded weights/biases are tiny -> fully VMEM-resident.
    in_specs = [pl.BlockSpec((tm, d_in_p), lambda i: (i, 0))]
    operands = [x_p]
    for w, b in zip(weights, biases):
        in_specs.append(pl.BlockSpec(w.shape, lambda i: (0, 0)))
        operands.append(w)
        in_specs.append(pl.BlockSpec(b.shape, lambda i: (0, 0)))
        operands.append(b)

    out = pl.pallas_call(
        autoencoder_kernel,
        out_shape=jax.ShapeDtypeStruct((n_p, d_out_p), out_dtype),
        grid_spec=pltpu.PrefetchScalarGridSpec(
            num_scalar_prefetch=0,
            grid=(n_p // tm,),
            in_specs=in_specs,
            out_specs=pl.BlockSpec((tm, d_out_p), lambda i: (i, 0)),
        ),
        compiler_params=pltpu.CompilerParams(
            # row tiles are independent -> shard across v7x's 2 TensorCores
            dimension_semantics=("parallel",)),
    )(*operands)

    return out[:n, :d_out]


def init_autoencoder_params(key, hidden_dim):
    """Deterministic synthetic parameters matching AutoEncoder.__init__ shapes.

    PyTorch nn.Linear weight is (out, in); we store the transpose (in, out)."""
    d = hidden_dim * 2
    dims = [(d, 100), (100, 64), (64, 100), (100, d)]
    params = {}
    keys = jax.random.split(key, len(dims))
    for idx, ((din, dout), k) in enumerate(zip(dims, keys), start=1):
        kw, kb = jax.random.split(k)
        scale = 1.0 / jnp.sqrt(din)
        params[f"w{idx}"] = jax.random.uniform(
            kw, (din, dout), jnp.float32, minval=-scale, maxval=scale)
        params[f"b{idx}"] = jax.random.uniform(
            kb, (1, dout), jnp.float32, minval=-scale, maxval=scale)
    return params


def autoencoder_ref(x, p):
    """Pure-JAX reference of AutoEncoder.forward for verification."""
    h = _leaky_relu(x @ p["w1"] + p["b1"])
    codes = _leaky_relu(h @ p["w2"] + p["b2"])
    h = _leaky_relu(codes @ p["w3"] + p["b3"])
    return jax.nn.sigmoid(h @ p["w4"] + p["b4"])


if __name__ == "__main__":
    # opt-like small config
    hidden_dim = 32          # -> AutoEncoder input/output dim = 2*hidden_dim = 64

    key = jax.random.PRNGKey(0)
    k_params, k_x1, k_x2 = jax.random.split(key, 3)
    params = init_autoencoder_params(k_params, hidden_dim)

    # 1) small edge-feature batch, f32 streaming (single grid step)
    x = jax.random.normal(k_x1, (16, hidden_dim * 2), jnp.float32)
    out = jax.block_until_ready(autoencoder_forward(x, params))
    ref = autoencoder_ref(x, params)
    assert out.shape == ref.shape == (16, hidden_dim * 2)
    # approx reciprocal in the sigmoid -> slightly looser tolerance than exact f32
    assert jnp.allclose(out, ref, atol=5e-3, rtol=5e-3), "f32 mismatch vs reference"

    # 2) larger, non-tile-aligned batch: exercises tm=512 tiling, row padding,
    #    and a multi-step "parallel" grid
    x2 = jax.random.normal(k_x2, (600, hidden_dim * 2), jnp.float32)
    out2 = jax.block_until_ready(autoencoder_forward(x2, params))
    ref2 = autoencoder_ref(x2, params)
    assert out2.shape == ref2.shape == (600, hidden_dim * 2)
    assert jnp.allclose(out2, ref2, atol=5e-3, rtol=5e-3), "tiled f32 mismatch"

    # 3) bf16-streamed variant (v6e/v7x HBM-roofline path); elementwise stays f32
    out_bf = jax.block_until_ready(
        autoencoder_forward(x2, params, compute_dtype=jnp.bfloat16))
    assert out_bf.dtype == jnp.bfloat16
    assert jnp.allclose(out_bf.astype(jnp.float32), ref2, atol=5e-2, rtol=5e-2), \
        "bf16 mismatch vs reference"

    print("KERNEL_OK")
</pallas_src>

<mosaic_0001>
module attributes {stable_mosaic.version = 11 : i64} {
  func.func @autoencoder_kernel(%arg0: i32, %arg1: memref<16x128xf32, #tpu.memory_space<vmem>>, %arg2: memref<128x128xf32, #tpu.memory_space<vmem>>, %arg3: memref<1x128xf32, #tpu.memory_space<vmem>>, %arg4: memref<128x128xf32, #tpu.memory_space<vmem>>, %arg5: memref<1x128xf32, #tpu.memory_space<vmem>>, %arg6: memref<128x128xf32, #tpu.memory_space<vmem>>, %arg7: memref<1x128xf32, #tpu.memory_space<vmem>>, %arg8: memref<128x128xf32, #tpu.memory_space<vmem>>, %arg9: memref<1x128xf32, #tpu.memory_space<vmem>>, %arg10: memref<16x128xf32, #tpu.memory_space<vmem>>) attributes {dimension_semantics = [#tpu.dimension_semantics<parallel>], iteration_bounds = array<i64: 1>, scalar_prefetch = 0 : i64, scratch_operands = 0 : i64, tpu.core_type = #tpu.core_type<tc>, window_params = [{transform_indices = @transform_0, window_bounds = array<i64: 16, 128>}, {pipeline_mode = #tpu.pipeline_mode<synchronous>, transform_indices = @transform_1, window_bounds = array<i64: 128, 128>}, {pipeline_mode = #tpu.pipeline_mode<synchronous>, transform_indices = @transform_2, window_bounds = array<i64: 1, 128>}, {pipeline_mode = #tpu.pipeline_mode<synchronous>, transform_indices = @transform_3, window_bounds = array<i64: 128, 128>}, {pipeline_mode = #tpu.pipeline_mode<synchronous>, transform_indices = @transform_4, window_bounds = array<i64: 1, 128>}, {pipeline_mode = #tpu.pipeline_mode<synchronous>, transform_indices = @transform_5, window_bounds = array<i64: 128, 128>}, {pipeline_mode = #tpu.pipeline_mode<synchronous>, transform_indices = @transform_6, window_bounds = array<i64: 1, 128>}, {pipeline_mode = #tpu.pipeline_mode<synchronous>, transform_indices = @transform_7, window_bounds = array<i64: 128, 128>}, {pipeline_mode = #tpu.pipeline_mode<synchronous>, transform_indices = @transform_8, window_bounds = array<i64: 1, 128>}, {transform_indices = @transform_9, window_bounds = array<i64: 16, 128>}]} {
    %c0 = arith.constant 0 : index
    %c0_0 = arith.constant 0 : index
    %0 = vector.load %arg1[%c0, %c0_0] : memref<16x128xf32, #tpu.memory_space<vmem>>, vector<16x128xf32>
    %c0_1 = arith.constant 0 : index
    %c0_2 = arith.constant 0 : index
    %1 = vector.load %arg2[%c0_1, %c0_2] : memref<128x128xf32, #tpu.memory_space<vmem>>, vector<128x128xf32>
    %cst = arith.constant dense<0.000000e+00> : vector<16x128xf32>
    %2 = tpu.matmul %0, %1, %cst {dimension_numbers = #tpu.dot_dimension_numbers<[1], [0], [0], [1], [0, 0, 1, 1], [], []>} : vector<16x128xf32>, vector<128x128xf32>, vector<16x128xf32> -> vector<16x128xf32>
    %c0_3 = arith.constant 0 : index
    %c0_4 = arith.constant 0 : index
    %3 = vector.load %arg3[%c0_3, %c0_4] : memref<1x128xf32, #tpu.memory_space<vmem>>, vector<1x128xf32>
    %4 = vector.broadcast %3 : vector<1x128xf32> to vector<16x128xf32>
    %5 = arith.addf %2, %4 : vector<16x128xf32>
    %cst_5 = arith.constant 0.000000e+00 : f32
    %6 = vector.broadcast %cst_5 : f32 to vector<16x128xf32>
    %7 = arith.cmpf ogt, %5, %6 : vector<16x128xf32>
    %cst_6 = arith.constant 1.000000e-01 : f32
    %8 = vector.broadcast %cst_6 : f32 to vector<16x128xf32>
    %9 = arith.mulf %8, %5 : vector<16x128xf32>
    %10 = arith.select %7, %5, %9 : vector<16x128xi1>, vector<16x128xf32>
    %c0_7 = arith.constant 0 : index
    %c0_8 = arith.constant 0 : index
    %11 = vector.load %arg4[%c0_7, %c0_8] : memref<128x128xf32, #tpu.memory_space<vmem>>, vector<128x128xf32>
    %cst_9 = arith.constant dense<0.000000e+00> : vector<16x128xf32>
    %12 = tpu.matmul %10, %11, %cst_9 {dimension_numbers = #tpu.dot_dimension_numbers<[1], [0], [0], [1], [0, 0, 1, 1], [], []>} : vector<16x128xf32>, vector<128x128xf32>, vector<16x128xf32> -> vector<16x128xf32>
    %c0_10 = arith.constant 0 : index
    %c0_11 = arith.constant 0 : index
    %13 = vector.load %arg5[%c0_10, %c0_11] : memref<1x128xf32, #tpu.memory_space<vmem>>, vector<1x128xf32>
    %14 = vector.broadcast %13 : vector<1x128xf32> to vector<16x128xf32>
    %15 = arith.addf %12, %14 : vector<16x128xf32>
    %cst_12 = arith.constant 0.000000e+00 : f32
    %16 = vector.broadcast %cst_12 : f32 to vector<16x128xf32>
    %17 = arith.cmpf ogt, %15, %16 : vector<16x128xf32>
    %cst_13 = arith.constant 1.000000e-01 : f32
    %18 = vector.broadcast %cst_13 : f32 to vector<16x128xf32>
    %19 = arith.mulf %18, %15 : vector<16x128xf32>
    %20 = arith.select %17, %15, %19 : vector<16x128xi1>, vector<16x128xf32>
    %c0_14 = arith.constant 0 : index
    %c0_15 = arith.constant 0 : index
    %21 = vector.load %arg6[%c0_14, %c0_15] : memref<128x128xf32, #tpu.memory_space<vmem>>, vector<128x128xf32>
    %cst_16 = arith.constant dense<0.000000e+00> : vector<16x128xf32>
    %22 = tpu.matmul %20, %21, %cst_16 {dimension_numbers = #tpu.dot_dimension_numbers<[1], [0], [0], [1], [0, 0, 1, 1], [], []>} : vector<16x128xf32>, vector<128x128xf32>, vector<16x128xf32> -> vector<16x128xf32>
    %c0_17 = arith.constant 0 : index
    %c0_18 = arith.constant 0 : index
    %23 = vector.load %arg7[%c0_17, %c0_18] : memref<1x128xf32, #tpu.memory_space<vmem>>, vector<1x128xf32>
    %24 = vector.broadcast %23 : vector<1x128xf32> to vector<16x128xf32>
    %25 = arith.addf %22, %24 : vector<16x128xf32>
    %cst_19 = arith.constant 0.000000e+00 : f32
    %26 = vector.broadcast %cst_19 : f32 to vector<16x128xf32>
    %27 = arith.cmpf ogt, %25, %26 : vector<16x128xf32>
    %cst_20 = arith.constant 1.000000e-01 : f32
    %28 = vector.broadcast %cst_20 : f32 to vector<16x128xf32>
    %29 = arith.mulf %28, %25 : vector<16x128xf32>
    %30 = arith.select %27, %25, %29 : vector<16x128xi1>, vector<16x128xf32>
    %c0_21 = arith.constant 0 : index
    %c0_22 = arith.constant 0 : index
    %31 = vector.load %arg8[%c0_21, %c0_22] : memref<128x128xf32, #tpu.memory_space<vmem>>, vector<128x128xf32>
    %cst_23 = arith.constant dense<0.000000e+00> : vector<16x128xf32>
    %32 = tpu.matmul %30, %31, %cst_23 {dimension_numbers = #tpu.dot_dimension_numbers<[1], [0], [0], [1], [0, 0, 1, 1], [], []>} : vector<16x128xf32>, vector<128x128xf32>, vector<16x128xf32> -> vector<16x128xf32>
    %c0_24 = arith.constant 0 : index
    %c0_25 = arith.constant 0 : index
    %33 = vector.load %arg9[%c0_24, %c0_25] : memref<1x128xf32, #tpu.memory_space<vmem>>, vector<1x128xf32>
    %34 = vector.broadcast %33 : vector<1x128xf32> to vector<16x128xf32>
    %35 = arith.addf %32, %34 : vector<16x128xf32>
    %cst_26 = arith.constant 0.000000e+00 : f32
    %36 = vector.broadcast %cst_26 : f32 to vector<16x128xf32>
    %37 = arith.subf %36, %35 : vector<16x128xf32>
    %38 = math.exp %37 : vector<16x128xf32>
    %cst_27 = arith.constant 1.000000e+00 : f32
    %39 = vector.broadcast %cst_27 : f32 to vector<16x128xf32>
    %40 = arith.addf %39, %38 : vector<16x128xf32>
    %41 = tpu.reciprocal %40 {approx = true} : vector<16x128xf32> -> vector<16x128xf32>
    %c0_28 = arith.constant 0 : index
    %c0_29 = arith.constant 0 : index
    %42 = vector.load %arg10[%c0_28, %c0_29] : memref<16x128xf32, #tpu.memory_space<vmem>>, vector<16x128xf32>
    tpu.vector_store %arg10[%c0_28, %c0_29], %41 {strides = array<i32>} : memref<16x128xf32, #tpu.memory_space<vmem>>, vector<16x128xf32>,
    return
  }
  func.func @transform_0(%arg0: i32) -> (i32, i32) {
    %c0_i32 = arith.constant 0 : i32
    %c0_i32_0 = arith.constant 0 : i32
    return %arg0, %c0_i32 : i32, i32
  }
  func.func @transform_1(%arg0: i32) -> (i32, i32) {
    %c0_i32 = arith.constant 0 : i32
    %c0_i32_0 = arith.constant 0 : i32
    %c0_i32_1 = arith.constant 0 : i32
    return %c0_i32, %c0_i32_0 : i32, i32
  }
  func.func @transform_2(%arg0: i32) -> (i32, i32) {
    %c0_i32 = arith.constant 0 : i32
    %c0_i32_0 = arith.constant 0 : i32
    %c0_i32_1 = arith.constant 0 : i32
    return %c0_i32, %c0_i32_0 : i32, i32
  }
  func.func @transform_3(%arg0: i32) -> (i32, i32) {
    %c0_i32 = arith.constant 0 : i32
    %c0_i32_0 = arith.constant 0 : i32
    %c0_i32_1 = arith.constant 0 : i32
    return %c0_i32, %c0_i32_0 : i32, i32
  }
  func.func @transform_4(%arg0: i32) -> (i32, i32) {
    %c0_i32 = arith.constant 0 : i32
    %c0_i32_0 = arith.constant 0 : i32
    %c0_i32_1 = arith.constant 0 : i32
    return %c0_i32, %c0_i32_0 : i32, i32
  }
  func.func @transform_5(%arg0: i32) -> (i32, i32) {
    %c0_i32 = arith.constant 0 : i32
    %c0_i32_0 = arith.constant 0 : i32
    %c0_i32_1 = arith.constant 0 : i32
    return %c0_i32, %c0_i32_0 : i32, i32
  }
  func.func @transform_6(%arg0: i32) -> (i32, i32) {
    %c0_i32 = arith.constant 0 : i32
    %c0_i32_0 = arith.constant 0 : i32
    %c0_i32_1 = arith.constant 0 : i32
    return %c0_i32, %c0_i32_0 : i32, i32
  }
  func.func @transform_7(%arg0: i32) -> (i32, i32) {
    %c0_i32 = arith.constant 0 : i32
    %c0_i32_0 = arith.constant 0 : i32
    %c0_i32_1 = arith.constant 0 : i32
    return %c0_i32, %c0_i32_0 : i32, i32
  }
  func.func @transform_8(%arg0: i32) -> (i32, i32) {
    %c0_i32 = arith.constant 0 : i32
    %c0_i32_0 = arith.constant 0 : i32
    %c0_i32_1 = arith.constant 0 : i32
    return %c0_i32, %c0_i32_0 : i32, i32
  }
  func.func @transform_9(%arg0: i32) -> (i32, i32) {
    %c0_i32 = arith.constant 0 : i32
    %c0_i32_0 = arith.constant 0 : i32
    return %arg0, %c0_i32 : i32, i32
  }
}

</mosaic_0001>

<bundles_post_ra>
// kernel: tpu_custom_call.1
= control target key start
LH: loop header
LB: loop body
LE: loop exit
PB: predicated region body
PF: predicated region fallthrough
CT: control target
= control target key end

     0   :  { %14 = vsyncpa [#allocation3], 0  ;;  %s1218_s0 = inlined_call_operand.hbm [shape: f32[16,128], index: 0, kind: input, shape index: {}]   ;;  %s1219_s1 = inlined_call_operand.hbm [shape: f32[128,128], index: 1, kind: input, shape index: {}]   ;;  %s1220_s2 = inlined_call_operand.vmem [shape: f32[1,128], index: 2, kind: input, shape index: {}]   ;;  %s1221_s3 = inlined_call_operand.hbm [shape: f32[128,128], index: 3, kind: input, shape index: {}]   ;;  %s1222_s4 = inlined_call_operand.vmem [shape: f32[1,128], index: 4, kind: input, shape index: {}]   ;;  %s1223_s5 = inlined_call_operand.hbm [shape: f32[128,128], index: 5, kind: input, shape index: {}]   ;;  %s1224_s6 = inlined_call_operand.vmem [shape: f32[1,128], index: 6, kind: input, shape index: {}]   ;;  %s1225_s7 = inlined_call_operand.hbm [shape: f32[128,128], index: 7, kind: input, shape index: {}]   ;;  %s1226_s8 = inlined_call_operand.vmem [shape: f32[1,128], index: 8, kind: input, shape index: {}]   ;;  %s1227_s9 = inlined_call_operand.hbm [shape: f32[16,128], index: 9, kind: output, shape index: {}]  }
   0x1   :  { %15 = vsyncpa [#allocation6], 0 }
   0x2   :  { %16 = vsyncpa [#allocation9], 0 }
   0x3   :  { %17 = vsyncpa [#allocation4], 0  ;;  %s1044_s30 = smov [#allocation5]   ;;  %s1045_s11 = smov [#allocation8]  }
   0x4   :  { %s35_s10 = sshll.u32 %s1044_s30, 4  ;;  %s63_s12 = sshll.u32 %s1045_s11, 4  ;;  %s36_s10 = int_to_ptr.vmem [resolvable:$true] %s35_s10  ;;  %s1102_s12 = int_to_ptr.vmem [resolvable:$true] %s63_s12 }
   0x5   :  { %s904_s15 = scalar_lea.hbm %s1219_s1, 2048 }
   0x6   :  { %p905_p0 = scmp.ne.s32.totalorder %s1219_s1, %s904_s15  ;;  %p908_p1 = scmp.lt.u32.totalorder %s904_s15, %s1219_s1 }
   0x8   :  { %p910_p2 = pnand %p908_p1, %p905_p0 }
   0xa   :  { %913 = shalt.err (!%p910_p2)
}
   0xb   :  { %s914_s20 = scalar_lea.vmem %s36_s10, 2048  ;;  %p919_p4 = scmp.lt.s32.totalorder %s36_s10, %s36_s10 }
   0xc   :  { %p915_p3 = scmp.ne.s32.totalorder %s36_s10, %s914_s20  ;;  %p920_p5 = scmp.lt.s32.totalorder %s914_s20, %s914_s20 }
   0xe   :  { %p921_p6 = por %p920_p5, %p919_p4 }
  0x10   :  { %p922_p7 = pnand %p921_p6, %p915_p3 }
  0x12   :  { %925 = shalt.err (!%p922_p7)
}
  0x13   :  { %s1046_s21 = smov 128   ;;  %s1047_s22 = smov 8  }
  0x14   :  { %41 = dma.hbm_to_vmem [thread:$0]  %s1219_s1, 2048, %s36_s10, [#allocation6], %s1046_s21, %s1046_s21, %s1047_s22  }
  0x15   :  { %s926_s27 = scalar_lea.hbm %s1223_s5, 2048 }
  0x16   :  { %p927_p8 = scmp.ne.s32.totalorder %s1223_s5, %s926_s27  ;;  %p930_p9 = scmp.lt.u32.totalorder %s926_s27, %s1223_s5 }
  0x18   :  { %p932_p10 = pnand %p930_p9, %p927_p8 }
  0x1a   :  { %935 = shalt.err (!%p932_p10)
}
  0x1b   :  { %s936_s13 = scalar_lea.vmem %s1102_s12, 2048  ;;  %p941_p12 = scmp.lt.s32.totalorder %s1102_s12, %s1102_s12 }
  0x1c   :  { %p937_p11 = scmp.ne.s32.totalorder %s1102_s12, %s936_s13  ;;  %p942_p13 = scmp.lt.s32.totalorder %s936_s13, %s936_s13 }
  0x1e   :  { %p943_p0 = por %p942_p13, %p941_p12 }
  0x20   :  { %p944_p1 = pnand %p943_p0, %p937_p11 }
  0x22   :  { %947 = shalt.err (!%p944_p1)
}
  0x23   :  { %69 = dma.hbm_to_vmem [thread:$0]  %s1223_s5, 2048, %s1102_s12, [#allocation9], %s1046_s21, %s1046_s21, %s1047_s22  }
  0x24   :  { %s1048_s14 = smov [#allocation2]   ;;  %s1049_s16 = smov [#allocation7]  }
  0x25   :  { %s23_s15 = sshll.u32 %s1048_s14, 4  ;;  %s49_s17 = sshll.u32 %s1049_s16, 4  ;;  %s24_s15 = int_to_ptr.vmem [resolvable:$true] %s23_s15  ;;  %s1139_s17 = int_to_ptr.vmem [resolvable:$true] %s49_s17 }
  0x26   :  { %s948_s20 = scalar_lea.hbm %s1218_s0, 256 }
  0x27   :  { %p949_p2 = scmp.ne.s32.totalorder %s1218_s0, %s948_s20  ;;  %p952_p3 = scmp.lt.u32.totalorder %s948_s20, %s1218_s0 }
  0x29   :  { %p954_p4 = pnand %p952_p3, %p949_p2 }
  0x2b   :  { %957 = shalt.err (!%p954_p4)
}
  0x2c   :  { %s958_s5 = scalar_lea.vmem %s24_s15, 256  ;;  %p963_p6 = scmp.lt.s32.totalorder %s24_s15, %s24_s15 }
  0x2d   :  { %p959_p5 = scmp.ne.s32.totalorder %s24_s15, %s958_s5  ;;  %p964_p7 = scmp.lt.s32.totalorder %s958_s5, %s958_s5 }
  0x2f   :  { %p965_p8 = por %p964_p7, %p963_p6 }
  0x31   :  { %p966_p9 = pnand %p965_p8, %p959_p5 }
  0x33   :  { %969 = shalt.err (!%p966_p9)
}
  0x34   :  { %29 = dma.hbm_to_vmem [thread:$0]  %s1218_s0, 256, %s24_s15, [#allocation3], %s1046_s21, %s1046_s21, %s1047_s22  }
  0x35   :  { %s970_s30 = scalar_lea.hbm %s1221_s3, 2048 }
  0x36   :  { %p971_p10 = scmp.ne.s32.totalorder %s1221_s3, %s970_s30  ;;  %p974_p11 = scmp.lt.u32.totalorder %s970_s30, %s1221_s3 }
  0x38   :  { %p976_p12 = pnand %p974_p11, %p971_p10 }
  0x3a   :  { %979 = shalt.err (!%p976_p12)
}
  0x3b   :  { %s980_s14 = scalar_lea.vmem %s1139_s17, 2048  ;;  %p985_p0 = scmp.lt.s32.totalorder %s1139_s17, %s1139_s17 }
  0x3c   :  { %p981_p13 = scmp.ne.s32.totalorder %s1139_s17, %s980_s14  ;;  %p986_p1 = scmp.lt.s32.totalorder %s980_s14, %s980_s14 }
  0x3e   :  { %p987_p2 = por %p986_p1, %p985_p0 }
  0x40   :  { %p988_p3 = pnand %p987_p2, %p981_p13 }
  0x42   :  { %991 = shalt.err (!%p988_p3)
}
  0x43   :  { %55 = dma.hbm_to_vmem [thread:$0]  %s1221_s3, 2048, %s1139_s17, [#allocation6], %s1046_s21, %s1046_s21, %s1047_s22  }
  0x44   :  { %s1050_s16 = smov [#allocation10]   ;;  %s992_s23 = scalar_lea.hbm %s1225_s7, 2048 }
  0x45   :  { %s77_s18 = sshll.u32 %s1050_s16, 4  ;;  %p993_p4 = scmp.ne.s32.totalorder %s1225_s7, %s992_s23  ;;  %s78_s18 = int_to_ptr.vmem [resolvable:$true] %s77_s18 }
  0x46   :  { %p996_p5 = scmp.lt.u32.totalorder %s992_s23, %s1225_s7 }
  0x48   :  { %p998_p6 = pnand %p996_p5, %p993_p4 }
  0x4a   :  { %1001 = shalt.err (!%p998_p6)
}
  0x4b   :  { %s1002_s12 = scalar_lea.vmem %s78_s18, 2048  ;;  %p1007_p8 = scmp.lt.s32.totalorder %s78_s18, %s78_s18 }
  0x4c   :  { %p1003_p7 = scmp.ne.s32.totalorder %s78_s18, %s1002_s12  ;;  %p1008_p9 = scmp.lt.s32.totalorder %s1002_s12, %s1002_s12 }
  0x4e   :  { %p1009_p10 = por %p1008_p9, %p1007_p8 }
  0x50   :  { %p1010_p11 = pnand %p1009_p10, %p1003_p7 }
  0x52   :  { %1013 = shalt.err (!%p1010_p11)
}
  0x53   :  { %83 = dma.hbm_to_vmem [thread:$0]  %s1225_s7, 2048, %s78_s18, [#allocation9], %s1046_s21, %s1046_s21, %s1047_s22  }
  0x54   :  { %1036 = dma.done.wait [#allocation3], 256  }
  0x55   :  { %1037 = vsyncadd [#allocation3], 4294967040 }
  0x56   :  { %1038 = dma.done.wait [#allocation6], 4096  }
  0x57   :  { %1039 = vsyncadd [#allocation6], 4294963200 }
  0x58   :  { %1040 = dma.done.wait [#allocation9], 4096  }
  0x59   :  { %1041 = vsyncadd [#allocation9], 4294963200  ;;  %v103_v0 = vld [vmem:[#allocation5] sm:$0xff]  ;;  %v104_v1 = vld [vmem:[#allocation5 + $0x8] sm:$0xff] }
  0x5a   :  { %v105_v2 = vld [vmem:[#allocation5 + $0x10] sm:$0xff]  ;;  %v760_v3 = vpack.c.bf16 %v104_v1, %v103_v0  ;;  %v106_v4 = vld [vmem:[#allocation5 + $0x18] sm:$0xff]  ;;  %v107_v6 = vld [vmem:[#allocation5 + $0x20] sm:$0xff] }
  0x5b   :  { %v764_v5 = vpack.c.bf16 %v106_v4, %v105_v2  ;;  %v108_v7 = vld [vmem:[#allocation5 + $0x28] sm:$0xff]  ;;  %v109_v9 = vld [vmem:[#allocation5 + $0x30] sm:$0xff]  ;;  %v110_v10 = vld [vmem:[#allocation5 + $0x38] sm:$0xff] }
  0x5c   :  { %761 = vmatprep.subr.bf16.mxu0 %v760_v3  ;;  %v768_v8 = vpack.c.bf16 %v108_v7, %v107_v6  ;;  %v101_v11 = vld [vmem:[#allocation2] sm:$0xff]  ;;  %v207_v12 = vld [vmem:[#allocation7] sm:$0xff]  ;;  %v208_v13 = vld [vmem:[#allocation7 + $0x8] sm:$0xff]  ;;  %v772_v20 = vpack.c.bf16 %v110_v10, %v109_v9 }
  0x5d   :  { %763 = vmatpush3.bf16.msra.mxu0 %v760_v3  ;;  %652 = vmatprep.mubr.f32.mxu0 %v101_v11  ;;  %v209_v14 = vld [vmem:[#allocation7 + $0x10] sm:$0xff]  ;;  %v792_v15 = vpack.c.bf16 %v208_v13, %v207_v12  ;;  %v210_v16 = vld [vmem:[#allocation7 + $0x18] sm:$0xff]  ;;  %v211_v18 = vld [vmem:[#allocation7 + $0x20] sm:$0xff] }
  0x5e   :  { %765 = vmatprep.subr.bf16.mxu0 %v764_v5  ;;  %v796_v17 = vpack.c.bf16 %v210_v16, %v209_v14  ;;  %v212_v19 = vld [vmem:[#allocation7 + $0x28] sm:$0xff]  ;;  %v111_v21 = vld [vmem:[#allocation5 + $0x40] sm:$0xff]  ;;  %v213_v24 = vld [vmem:[#allocation7 + $0x30] sm:$0xff] }
  0x5f   :  { %793 = vmatprep.subr.bf16.mxu1 %v792_v15  ;;  %v112_v22 = vld [vmem:[#allocation5 + $0x48] sm:$0xff]  ;;  %v800_v23 = vpack.c.bf16 %v212_v19, %v211_v18  ;;  %v214_v25 = vld [vmem:[#allocation7 + $0x38] sm:$0xff]  ;;  %v113_v27 = vld [vmem:[#allocation5 + $0x50] sm:$0xff] }
  0x60   :  { %795 = vmatpush3.bf16.msra.mxu1 %v792_v15  ;;  %v776_v26 = vpack.c.bf16 %v112_v22, %v111_v21  ;;  %v114_v28 = vld [vmem:[#allocation5 + $0x58] sm:$0xff]  ;;  %v804_v29 = vpack.c.bf16 %v214_v25, %v213_v24  ;;  %v215_v30 = vld [vmem:[#allocation7 + $0x40] sm:$0xff]  ;;  %v216_v31 = vld [vmem:[#allocation7 + $0x48] sm:$0xff] }
  0x61   :  { %767 = vmatpush3.bf16.msra.mxu0 %v764_v5  ;;  %797 = vmatprep.subr.bf16.mxu1 %v796_v17  ;;  %v780_v32 = vpack.c.bf16 %v114_v28, %v113_v27  ;;  %v115_v33 = vld [vmem:[#allocation5 + $0x60] sm:$0xff]  ;;  %v116_v34 = vld [vmem:[#allocation5 + $0x68] sm:$0xff]  ;;  %v808_v35 = vpack.c.bf16 %v216_v31, %v215_v30  ;;  %v217_v36 = vld [vmem:[#allocation7 + $0x50] sm:$0xff] }
  0x62   :  { %769 = vmatprep.subr.bf16.mxu0 %v768_v8  ;;  %v218_v37 = vld [vmem:[#allocation7 + $0x58] sm:$0xff]  ;;  %v784_v38 = vpack.c.bf16 %v116_v34, %v115_v33  ;;  %v117_v39 = vld [vmem:[#allocation5 + $0x70] sm:$0xff]  ;;  %v219_v44 = vld [vmem:[#allocation7 + $0x60] sm:$0xff] }
  0x63   :  { %v118_v40 = vld [vmem:[#allocation5 + $0x78] sm:$0xff]  ;;  %v812_v41 = vpack.c.bf16 %v218_v37, %v217_v36  ;;  %v220_v45 = vld [vmem:[#allocation7 + $0x68] sm:$0xff]  ;;  %v221_v47 = vld [vmem:[#allocation7 + $0x70] sm:$0xff] }
  0x64   :  { %799 = vmatpush3.bf16.msra.mxu1 %v796_v17  ;;  %v788_v42 = vpack.c.bf16 %v118_v40, %v117_v39  ;;  %v102_v43 = vld [vmem:[#allocation2 + $0x8] sm:$0xff]  ;;  %v816_v46 = vpack.c.bf16 %v220_v45, %v219_v44  ;;  %v311_v50 = vld [vmem:[#allocation8] sm:$0xff]  ;;  %v312_v51 = vld [vmem:[#allocation8 + $0x8] sm:$0xff] }
  0x65   :  { %771 = vmatpush3.bf16.msra.mxu0 %v768_v8  ;;  %801 = vmatprep.subr.bf16.mxu1 %v800_v23  ;;  %v222_v48 = vld [vmem:[#allocation7 + $0x78] sm:$0xff]  ;;  %v313_v52 = vld [vmem:[#allocation8 + $0x10] sm:$0xff]  ;;  %v824_v53 = vpack.c.bf16 %v312_v51, %v311_v50  ;;  %v315_v56 = vld [vmem:[#allocation8 + $0x20] sm:$0xff] }
  0x66   :  { %773 = vmatprep.subr.bf16.mxu0 %v772_v20  ;;  %v820_v49 = vpack.c.bf16 %v222_v48, %v221_v47  ;;  %v314_v54 = vld [vmem:[#allocation8 + $0x18] sm:$0xff]  ;;  %v316_v57 = vld [vmem:[#allocation8 + $0x28] sm:$0xff]  ;;  %v317_v59 = vld [vmem:[#allocation8 + $0x30] sm:$0xff] }
  0x67   :  { %v828_v55 = vpack.c.bf16 %v314_v54, %v313_v52  ;;  %v832_v58 = vpack.c.bf16 %v316_v57, %v315_v56  ;;  %v318_v60 = vld [vmem:[#allocation8 + $0x38] sm:$0xff]  ;;  %v319_v62 = vld [vmem:[#allocation8 + $0x40] sm:$0xff]  ;;  %v320_v63 = vld [vmem:[#allocation8 + $0x48] sm:$0xff] }
  0x68   :  { %803 = vmatpush3.bf16.msra.mxu1 %v800_v23  ;;  %v836_v61 = vpack.c.bf16 %v318_v60, %v317_v59  ;;  %v840_v0 = vpack.c.bf16 %v320_v63, %v319_v62  ;;  %v321_v1 = vld [vmem:[#allocation8 + $0x50] sm:$0xff]  ;;  %v322_v2 = vld [vmem:[#allocation8 + $0x58] sm:$0xff]  ;;  %v323_v13 = vld [vmem:[#allocation8 + $0x60] sm:$0xff] }
  0x69   :  { %775 = vmatpush3.bf16.msra.mxu0 %v772_v20  ;;  %805 = vmatprep.subr.bf16.mxu1 %v804_v29  ;;  %v844_v3 = vpack.c.bf16 %v322_v2, %v321_v1  ;;  %v544_v4 = vld [vmem:[%s1220_s2] ss:$0 sm:$0xff]  ;;  %v324_v14 = vld [vmem:[#allocation8 + $0x68] sm:$0xff]  ;;  %v326_v17 = vld [vmem:[#allocation8 + $0x78] sm:$0xff] }
  0x6a   :  { %777 = vmatprep.subr.bf16.mxu0 %v776_v26  ;;  %v848_v15 = vpack.c.bf16 %v324_v14, %v323_v13  ;;  %v325_v16 = vld [vmem:[#allocation8 + $0x70] sm:$0xff]  ;;  %v415_v19 = vld [vmem:[#allocation10] sm:$0xff]  ;;  %v416_v20 = vld [vmem:[#allocation10 + $0x8] sm:$0xff] }
  0x6b   :  { %v852_v18 = vpack.c.bf16 %v326_v17, %v325_v16  ;;  %v417_v21 = vld [vmem:[#allocation10 + $0x10] sm:$0xff]  ;;  %v856_v22 = vpack.c.bf16 %v416_v20, %v415_v19  ;;  %v418_v23 = vld [vmem:[#allocation10 + $0x18] sm:$0xff]  ;;  %v419_v25 = vld [vmem:[#allocation10 + $0x20] sm:$0xff] }
  0x6c   :  { %807 = vmatpush3.bf16.msra.mxu1 %v804_v29  ;;  %v860_v24 = vpack.c.bf16 %v418_v23, %v417_v21  ;;  %v421_v28 = vld [vmem:[#allocation10 + $0x30] sm:$0xff]  ;;  %v422_v29 = vld [vmem:[#allocation10 + $0x38] sm:$0xff]  ;;  %v423_v31 = vld [vmem:[#allocation10 + $0x40] sm:$0xff] }
  0x6d   :  { %779 = vmatpush3.bf16.msra.mxu0 %v776_v26  ;;  %809 = vmatprep.subr.bf16.mxu1 %v808_v35  ;;  %v420_v26 = vld [vmem:[#allocation10 + $0x28] sm:$0xff]  ;;  %v868_v30 = vpack.c.bf16 %v422_v29, %v421_v28  ;;  %v425_v34 = vld [vmem:[#allocation10 + $0x50] sm:$0xff]  ;;  %v430_v50 = vld [vmem:[#allocation10 + $0x78] sm:$0xff] }
  0x6e   :  { %781 = vmatprep.subr.bf16.mxu0 %v780_v32  ;;  %v864_v27 = vpack.c.bf16 %v420_v26, %v419_v25  ;;  %v545_v37 = vld [vmem:[%s1222_s4] ss:$0 sm:$0xff]  ;;  %v428_v47 = vld [vmem:[#allocation10 + $0x68] sm:$0xff] }
  0x6f   :  { %v546_v52 = vld [vmem:[%s1224_s6] ss:$0 sm:$0xff]  ;;  %s1051_s6 = smov [#allocation11]  }
  0x70   :  { %811 = vmatpush3.bf16.msra.mxu1 %v808_v35  ;;  %v426_v35 = vld [vmem:[#allocation10 + $0x58] sm:$0xff]  ;;  %s530_s13 = sshll.u32 %s1051_s6, 4  ;;  %s531_s13 = int_to_ptr.vmem [resolvable:$true] %s530_s13 }
  0x71   :  { %783 = vmatpush3.bf16.msra.mxu0 %v780_v32  ;;  %813 = vmatprep.subr.bf16.mxu1 %v812_v41  ;;  %v424_v32 = vld [vmem:[#allocation10 + $0x48] sm:$0xff]  ;;  %v876_v36 = vpack.c.bf16 %v426_v35, %v425_v34  ;;  %p1019_p13 = scmp.lt.s32.totalorder %s531_s13, %s531_s13 }
  0x72   :  { %785 = vmatprep.subr.bf16.mxu0 %v784_v38  ;;  %v872_v33 = vpack.c.bf16 %v424_v32, %v423_v31 }
  0x74   :  { %815 = vmatpush3.bf16.msra.mxu1 %v812_v41 }
  0x75   :  { %787 = vmatpush3.bf16.msra.mxu0 %v784_v38  ;;  %817 = vmatprep.subr.bf16.mxu1 %v816_v46 }
  0x76   :  { %789 = vmatprep.subr.bf16.mxu0 %v788_v42 }
  0x78   :  { %819 = vmatpush3.bf16.msra.mxu1 %v816_v46  ;;  %v427_v46 = vld [vmem:[#allocation10 + $0x60] sm:$0xff] }
  0x79   :  { %791 = vmatpush3.bf16.msra.mxu0 %v788_v42  ;;  %821 = vmatprep.subr.bf16.mxu1 %v820_v49  ;;  %v880_v48 = vpack.c.bf16 %v428_v47, %v427_v46 }
  0x7a   :  { %825 = vmatprep.subr.bf16.mxu0 %v824_v53 }
  0x7c   :  { %653 = vmatmul.mubr.f32.vlgmr.msra.gmra.mrb[0].mxu0 %v102_v43  ;;  %823 = vmatpush3.bf16.msra.mxu1 %v820_v49  ;;  %v429_v49 = vld [vmem:[#allocation10 + $0x70] sm:$0xff] }
  0x7d   :  { %827 = vmatpush3.bf16.msra.mxu0 %v824_v53  ;;  %857 = vmatprep.subr.bf16.mxu1 %v856_v22  ;;  %v884_v51 = vpack.c.bf16 %v430_v50, %v429_v49 }
  0x7e   :  { %829 = vmatprep.subr.bf16.mxu0 %v828_v55 }
  0x81   :  { %831 = vmatpush3.bf16.msra.mxu0 %v828_v55 }
  0x82   :  { %833 = vmatprep.subr.bf16.mxu0 %v832_v58 }
  0x85   :  { %835 = vmatpush3.bf16.msra.mxu0 %v832_v58 }
  0x86   :  { %837 = vmatprep.subr.bf16.mxu0 %v836_v61 }
  0x89   :  { %839 = vmatpush3.bf16.msra.mxu0 %v836_v61  ;;  %v547_v61 = vld [vmem:[%s1226_s8] ss:$0 sm:$0xff]  ;;  %s1014_s8 = scalar_lea.vmem %s531_s13, 256 }
  0x8a   :  { %841 = vmatprep.subr.bf16.mxu0 %v840_v0  ;;  %p1015_p12 = scmp.ne.s32.totalorder %s531_s13, %s1014_s8  ;;  %p1020_p0 = scmp.lt.s32.totalorder %s1014_s8, %s1014_s8 }
  0x8c   :  { %p1021_p1 = por %p1020_p0, %p1019_p13 }
  0x8d   :  { %843 = vmatpush3.bf16.msra.mxu0 %v840_v0 }
  0x8e   :  { %845 = vmatprep.subr.bf16.mxu0 %v844_v3  ;;  %p1022_p2 = pnand %p1021_p1, %p1015_p12 }
  0x91   :  { %847 = vmatpush3.bf16.msra.mxu0 %v844_v3 }
  0x92   :  { %849 = vmatprep.subr.bf16.mxu0 %v848_v15 }
  0x95   :  { %851 = vmatpush3.bf16.msra.mxu0 %v848_v15 }
  0x96   :  { %853 = vmatprep.subr.bf16.mxu0 %v852_v18 }
  0x99   :  { %855 = vmatpush3.bf16.msra.mxu0 %v852_v18 }
 0x14f   :  { %v654_v5 = vpop.f32.mrb[0].mxu0 }
 0x150   :  { %v198_v6 = vadd.f32 %v654_v5, %v544_v4  ;;  %v192_v7 = vpop.f32.mrb[1].mxu0 }
 0x151   :  { %v193_v8 = vadd.f32 %v544_v4, %v192_v7 }
 0x152   :  { %v204_v9 = vmul.f32 0.1, %v198_v6  ;;  %vm202_vm1 = vcmp.gt.f32.partialorder %v198_v6, 0.0 }
 0x153   :  { %vm201_vm0 = vcmp.gt.f32.partialorder %v193_v8, 0.0  ;;  %v203_v10 = vmul.f32 0.1, %v193_v8 }
 0x154   :  { %v206_v12 = vsel %vm202_vm1, %v198_v6, %v204_v9 }
 0x155   :  { %v205_v11 = vsel %vm201_vm0, %v193_v8, %v203_v10 }
 0x156   :  { %687 = vmatprep.mubr.f32.mxu1 %v205_v11 }
 0x157   :  { %688 = vmatmul.mubr.f32.vlgmr.msra.gmra.mrb[0].mxu1 %v206_v12 }
 0x158   :  { %859 = vmatpush3.bf16.msra.mxu1 %v856_v22 }
 0x159   :  { %861 = vmatprep.subr.bf16.mxu1 %v860_v24 }
 0x15c   :  { %863 = vmatpush3.bf16.msra.mxu1 %v860_v24 }
 0x15d   :  { %865 = vmatprep.subr.bf16.mxu1 %v864_v27 }
 0x160   :  { %867 = vmatpush3.bf16.msra.mxu1 %v864_v27 }
 0x161   :  { %869 = vmatprep.subr.bf16.mxu1 %v868_v30 }
 0x164   :  { %871 = vmatpush3.bf16.msra.mxu1 %v868_v30 }
 0x165   :  { %873 = vmatprep.subr.bf16.mxu1 %v872_v33 }
 0x168   :  { %875 = vmatpush3.bf16.msra.mxu1 %v872_v33 }
 0x169   :  { %877 = vmatprep.subr.bf16.mxu1 %v876_v36 }
 0x16c   :  { %879 = vmatpush3.bf16.msra.mxu1 %v876_v36 }
 0x16d   :  { %881 = vmatprep.subr.bf16.mxu1 %v880_v48 }
 0x170   :  { %883 = vmatpush3.bf16.msra.mxu1 %v880_v48 }
 0x171   :  { %885 = vmatprep.subr.bf16.mxu1 %v884_v51 }
 0x174   :  { %887 = vmatpush3.bf16.msra.mxu1 %v884_v51 }
 0x22a   :  { %v689_v38 = vpop.f32.mrb[0].mxu1 }
 0x22b   :  { %v302_v39 = vadd.f32 %v689_v38, %v545_v37  ;;  %v296_v40 = vpop.f32.mrb[1].mxu1 }
 0x22c   :  { %v297_v41 = vadd.f32 %v545_v37, %v296_v40 }
 0x22d   :  { %v308_v42 = vmul.f32 0.1, %v302_v39  ;;  %vm306_vm2 = vcmp.gt.f32.partialorder %v302_v39, 0.0 }
 0x22e   :  { %v307_v43 = vmul.f32 0.1, %v297_v41  ;;  %vm305_vm3 = vcmp.gt.f32.partialorder %v297_v41, 0.0 }
 0x22f   :  { %v310_v45 = vsel %vm306_vm2, %v302_v39, %v308_v42 }
 0x230   :  { %v309_v44 = vsel %vm305_vm3, %v297_v41, %v307_v43 }
 0x231   :  { %722 = vmatprep.mubr.f32.mxu0 %v309_v44 }
 0x232   :  { %723 = vmatmul.mubr.f32.vlgmr.msra.gmra.mrb[2].mxu0 %v310_v45 }
 0x305   :  { %v724_v53 = vpop.f32.mrb[2].mxu0 }
 0x306   :  { %v406_v54 = vadd.f32 %v724_v53, %v546_v52  ;;  %v400_v55 = vpop.f32.mrb[3].mxu0 }
 0x307   :  { %v401_v56 = vadd.f32 %v546_v52, %v400_v55 }
 0x308   :  { %v412_v57 = vmul.f32 0.1, %v406_v54  ;;  %vm410_vm4 = vcmp.gt.f32.partialorder %v406_v54, 0.0 }
 0x309   :  { %v411_v58 = vmul.f32 0.1, %v401_v56  ;;  %vm409_vm5 = vcmp.gt.f32.partialorder %v401_v56, 0.0 }
 0x30a   :  { %v414_v60 = vsel %vm410_vm4, %v406_v54, %v412_v57 }
 0x30b   :  { %v413_v59 = vsel %vm409_vm5, %v401_v56, %v411_v58 }
 0x30c   :  { %757 = vmatprep.mubr.f32.mxu1 %v413_v59 }
 0x30d   :  { %758 = vmatmul.mubr.f32.vlgmr.msra.gmra.mrb[2].mxu1 %v414_v60 }
 0x3e0   :  { %v759_v62 = vpop.f32.mrb[2].mxu1 }
 0x3e1   :  { %v510_v63 = vadd.f32 %v759_v62, %v547_v61  ;;  %v504_v0 = vpop.f32.mrb[3].mxu1 }
 0x3e2   :  { %v505_v1 = vadd.f32 %v547_v61, %v504_v0 }
 0x3e3   :  { %v514_v2 = vsub.f32 0.0, %v510_v63 }
 0x3e4   :  { %v513_v3 = vsub.f32 0.0, %v505_v1 }
 0x3e5   :  { %v517_v4 = vmul.f32 1.442695, %v514_v2 }
 0x3e6   :  { %v515_v5 = vmul.f32 1.442695, %v513_v3 }
 0x3e7   :  { %896 = vpow2.f32 %v517_v4 }
 0x3e8   :  { %898 = vpow2.f32 %v515_v5 }
 0x3f1   :  { %v897_v6 = vpop.eup %896 }
 0x3f2   :  { %v899_v7 = vpop.eup %898  ;;  %v520_v8 = vadd.f32 1.0, %v897_v6 }
 0x3f3   :  { %v519_v9 = vadd.f32 1.0, %v899_v7 }
 0x3f4   :  { %900 = vrcp.f32 %v520_v8 }
 0x3f5   :  { %902 = vrcp.f32 %v519_v9 }
 0x3fe   :  { %v901_v10 = vpop.eup %900 }
 0x3ff   :  { %v903_v11 = vpop.eup %902  ;;  %524 = vst [vmem:[#allocation11 + $0x8] sm:$0xff] %v901_v10 }
 0x400   :  { %523 = vst [vmem:[#allocation11] sm:$0xff] %v903_v11 }
 0x401   :  { %1025 = shalt.err (!%p1022_p2)
}
 0x402   :  { %s1026_s14 = scalar_lea.hbm %s1227_s9, 256 }
 0x403   :  { %p1027_p3 = scmp.ne.s32.totalorder %s1227_s9, %s1026_s14  ;;  %p1030_p4 = scmp.lt.u32.totalorder %s1026_s14, %s1227_s9 }
 0x405   :  { %p1032_p5 = pnand %p1030_p4, %p1027_p3 }
 0x407   :  { %1035 = shalt.err (!%p1032_p5)
}
 0x408   :  { %536 = dma.vmem_to_hbm [thread:$0]  %s531_s13, 256, %s1227_s9, [#allocation4], %s1046_s21, %s1046_s21, %s1047_s22  }
 0x409   :  { %1042 = dma.done.wait [#allocation4], 256  }
 0x40a   :  { %1043 = vsyncadd [#allocation4], 4294967040 }
 0x40b   :  { %540 = vsyncpa [#allocation3], 1 }
 0x40c   :  { %541 = vsyncpa [#allocation6], 1 }
 0x40d   :  { %542 = vsyncpa [#allocation9], 1 }
 0x40e   :  { %543 = vsyncpa [#allocation4], 1 }

</bundles_post_ra>
